<compile_context>
chip_gen: v5e
topology: v5e:2x2
jax: 0.10.0
libtpu: 0.0.40
codegen_flags: <defaults>
</compile_context>

<pallas_src>
import math
import jax
import jax.numpy as jnp
from jax import lax
from jax.experimental import pallas as pl
from jax.experimental.pallas import tpu as pltpu

_LANE = 128
_INV_SQRT2 = 0.7071067811865476


def _round_up(x, m):
    return (x + m - 1) // m * m


def _cdiv(a, b):
    return -(-a // b)


def _gelu_exact(x):
    # exact GELU (matches torch.nn.GELU default), computed in f32
    return 0.5 * x * (1.0 + lax.erf(x * _INV_SQRT2))


def _pred_net_kernel(x_ref, w1_ref, b1_ref, w2_ref, b2_ref, wf_ref, bf_ref, o_ref):
    mxu_dtype = w1_ref.dtype
    x = x_ref[...]                                   # (TILE_B, Dp), compute dtype
    x_f32 = x.astype(jnp.float32)

    # fc1 -> (dropout: identity in eval) -> GELU -> skip (non-MXU math in f32)
    h1 = jnp.dot(x, w1_ref[...], preferred_element_type=jnp.float32)
    h1 = _gelu_exact(h1 + b1_ref[...]) + x_f32

    # fc2 -> (dropout: identity) -> GELU -> skip
    h2 = jnp.dot(h1.astype(mxu_dtype), w2_ref[...], preferred_element_type=jnp.float32)
    h2 = _gelu_exact(h2 + b2_ref[...]) + h1

    # final (D -> 1) projection on the VPU + lane reduction on the XLU instead of a
    # 128x-zero-padded MXU matmul; bf is a scalar in SMEM.
    z = jnp.sum(h2 * wf_ref[...], axis=-1, keepdims=True) + bf_ref[0, 0]   # (TILE_B, 1)
    p = jax.nn.sigmoid(z)

    # lane-dense 128-wide store; wrapper keeps column 0.
    o_ref[...] = jnp.broadcast_to(p, o_ref.shape).astype(o_ref.dtype)


def _vmem_budget_bytes():
    """Per-generation usable-VMEM budget with headroom for Mosaic internal scratch."""
    phys = 128 << 20
    try:
        info = pltpu.get_tpu_info()
        phys = int(info.vmem_capacity_bytes)
    except Exception:
        pass
    if phys <= 0:
        phys = 128 << 20
    if phys <= (64 << 20):                 # v7x: 64 MiB / TC -> leave ~8 MiB headroom
        return phys - (8 << 20)
    return min(phys - (16 << 20), 110 << 20)   # v5e / v6e: 128 MiB physical


def pred_net_forward(x, params, *, tile_b=None, use_bf16_mxu=True):
    """Pallas forward of Pred_net (eval mode).

    x: [B, D]; params: dict with weights stored as [in, out] (transposed vs PyTorch).
    By default matmuls run on the bf16 MXU path with f32 accumulation; pass
    use_bf16_mxu=False for an exact-x.dtype matmul path. Returns f32 probs [B, 1].
    """
    B, D = x.shape
    w1, b1 = params["w1"], params["b1"]
    w2, b2 = params["w2"], params["b2"]
    wf, bf = params["wf"], params["bf"]
    assert w1.shape == (D, D) and w2.shape == (D, D) and wf.shape == (D, 1)

    mxu_dtype = jnp.bfloat16 if use_bf16_mxu else x.dtype
    itemsize = jnp.dtype(mxu_dtype).itemsize
    sub = max(8, 32 // itemsize)                     # 8 (f32) / 16 (bf16) sublane granule
    Dp = _round_up(D, _LANE)                         # lane-align features
    out_dtype = mxu_dtype

    # Balanced batch tiles (avoid up-to-tile_b padded rows) + megacore awareness
    # (>= 2 grid steps when the batch allows, so "parallel" splits across 2 TCs on v7x).
    target = 256 if (Dp >= 2048 and itemsize == 4) else 512
    if tile_b is None:
        num_tiles = max(1, _cdiv(B, target))
        if B >= 2 * sub:
            num_tiles = max(num_tiles, 2)
        tile_b = _round_up(_cdiv(B, num_tiles), sub)
    else:
        tile_b = _round_up(max(tile_b, sub), sub)
    num_tiles = _cdiv(B, tile_b)
    Bp = num_tiles * tile_b

    pad2 = lambda a, r, c: jnp.pad(a, ((0, r - a.shape[0]), (0, c - a.shape[1])))
    xp = pad2(x.astype(mxu_dtype), Bp, Dp)
    w1p = pad2(w1.astype(mxu_dtype), Dp, Dp)
    w2p = pad2(w2.astype(mxu_dtype), Dp, Dp)
    b1p = pad2(jnp.asarray(b1, jnp.float32).reshape(1, D), 1, Dp)
    b2p = pad2(jnp.asarray(b2, jnp.float32).reshape(1, D), 1, Dp)
    wfp = pad2(jnp.asarray(wf, jnp.float32).reshape(1, D), 1, Dp)
    bfp = jnp.asarray(bf, jnp.float32).reshape(1, 1)

    # Resident operands: constant index_map + single pipeline buffer.
    resident = lambda shape: pl.BlockSpec(shape, lambda i: (0, 0),
                                          pipeline_mode=pl.Buffered(1))

    # VMEM footprint: single-buffered weights + double-buffered x / out streams + f32 temps.
    vmem_est = ((2 * Dp * Dp) * itemsize                              # w1, w2 (1 buffer each)
                + 3 * Dp * 4                                          # b1, b2, wf rows (f32)
                + 2 * tile_b * Dp * itemsize                          # x stream
                + 2 * tile_b * _LANE * jnp.dtype(out_dtype).itemsize  # out stream
                + 3 * tile_b * Dp * 4)                                # f32 temps
    vmem_limit = int(min(max(vmem_est + (8 << 20), 32 << 20), _vmem_budget_bytes()))

    out_padded = pl.pallas_call(
        _pred_net_kernel,
        out_shape=jax.ShapeDtypeStruct((Bp, _LANE), out_dtype),
        grid=(num_tiles,),
        in_specs=[
            pl.BlockSpec((tile_b, Dp), lambda i: (i, 0)),        # x  (streamed over batch)
            resident((Dp, Dp)),                                  # w1 (resident, 1 buffer)
            resident((1, Dp)),                                   # b1 (f32)
            resident((Dp, Dp)),                                  # w2
            resident((1, Dp)),                                   # b2 (f32)
            resident((1, Dp)),                                   # wf row (f32)
            pl.BlockSpec(memory_space=pltpu.MemorySpace.SMEM),   # bf scalar
        ],
        out_specs=pl.BlockSpec((tile_b, _LANE), lambda i: (i, 0)),
        compiler_params=pltpu.CompilerParams(
            dimension_semantics=("parallel",),
            vmem_limit_bytes=vmem_limit,
        ),
    )(xp, w1p, b1p, w2p, b2p, wfp, bfp)

    return out_padded[:B, :1].astype(jnp.float32)


def init_params(key, input_dim, hidden_dim):
    """Deterministic init matching PyTorch nn.Linear (weights stored [in, out])."""
    ks = jax.random.split(key, 6)

    def linear(kw, kb, fan_in, fan_out):
        bound = 1.0 / math.sqrt(fan_in)
        w = jax.random.uniform(kw, (fan_in, fan_out), jnp.float32, -bound, bound)
        b = jax.random.uniform(kb, (1, fan_out), jnp.float32, -bound, bound)
        return w, b

    w1, b1 = linear(ks[0], ks[1], input_dim, hidden_dim)
    w2, b2 = linear(ks[2], ks[3], hidden_dim, hidden_dim)
    wf, bf = linear(ks[4], ks[5], hidden_dim, 1)
    return {"w1": w1, "b1": b1, "w2": w2, "b2": b2, "wf": wf, "bf": bf}


def pred_net_reference(x, p):
    """Pure-JAX reference of the PyTorch forward (eval mode)."""
    x = x.astype(jnp.float32)
    h1 = jax.nn.gelu(x @ p["w1"] + p["b1"], approximate=False) + x
    h2 = jax.nn.gelu(h1 @ p["w2"] + p["b2"], approximate=False) + h1
    z = h2 @ p["wf"] + p["bf"]
    return jax.nn.sigmoid(z)


if __name__ == "__main__":
    key = jax.random.PRNGKey(0)
    k_x, k_p, k_x2 = jax.random.split(key, 3)

    # Small shape consistent with the module (skip connections require input_dim == hidden_dim).
    batch, dim = 2, 32
    x = jax.random.normal(k_x, (batch, dim), jnp.float32)
    params = init_params(k_p, dim, dim)
    ref = pred_net_reference(x, params)

    # Default path: bf16 MXU, f32 accumulation.
    out = jax.block_until_ready(pred_net_forward(x, params))
    assert out.shape == (batch, 1)
    assert jnp.allclose(out, ref, atol=3e-2, rtol=3e-2), (out, ref)

    # Exact f32 MXU path.
    out_f32 = jax.block_until_ready(pred_net_forward(x, params, use_bf16_mxu=False))
    assert jnp.allclose(out_f32, ref, atol=1e-4, rtol=1e-4), (out_f32, ref)

    # Multi-tile grid + batch padding: 300 rows -> 2 balanced tiles (auto) and 3 tiles (tile_b=128).
    xb = jax.random.normal(k_x2, (300, dim), jnp.float32)
    refb = pred_net_reference(xb, params)
    outb = jax.block_until_ready(pred_net_forward(xb, params))
    outc = jax.block_until_ready(pred_net_forward(xb, params, tile_b=128))
    assert outb.shape == (300, 1) and outc.shape == (300, 1)
    assert jnp.allclose(outb, refb, atol=3e-2, rtol=3e-2)
    assert jnp.allclose(outc, refb, atol=3e-2, rtol=3e-2)

    # bf16 inputs.
    out_bf16 = jax.block_until_ready(pred_net_forward(x.astype(jnp.bfloat16), params))
    assert out_bf16.shape == (batch, 1)
    assert jnp.allclose(out_bf16, ref, atol=3e-2, rtol=3e-2), (out_bf16, ref)

    print("KERNEL_OK")
</pallas_src>

<mosaic_0001>
module attributes {stable_mosaic.version = 11 : i64} {
  func.func @_pred_net_kernel(%arg0: i32, %arg1: memref<16x128xbf16, #tpu.memory_space<vmem>>, %arg2: memref<128x128xbf16, #tpu.memory_space<vmem>>, %arg3: memref<1x128xf32, #tpu.memory_space<vmem>>, %arg4: memref<128x128xbf16, #tpu.memory_space<vmem>>, %arg5: memref<1x128xf32, #tpu.memory_space<vmem>>, %arg6: memref<1x128xf32, #tpu.memory_space<vmem>>, %arg7: memref<1x1xf32, #tpu.memory_space<smem>>, %arg8: memref<16x128xbf16, #tpu.memory_space<vmem>>) attributes {dimension_semantics = [#tpu.dimension_semantics<parallel>], iteration_bounds = array<i64: 1>, scalar_prefetch = 0 : i64, scratch_operands = 0 : i64, tpu.core_type = #tpu.core_type<tc>, window_params = [{transform_indices = @transform_0, window_bounds = array<i64: 16, 128>}, {pipeline_mode = #tpu.pipeline_mode<synchronous>, transform_indices = @transform_1, window_bounds = array<i64: 128, 128>}, {pipeline_mode = #tpu.pipeline_mode<synchronous>, transform_indices = @transform_2, window_bounds = array<i64: 1, 128>}, {pipeline_mode = #tpu.pipeline_mode<synchronous>, transform_indices = @transform_3, window_bounds = array<i64: 128, 128>}, {pipeline_mode = #tpu.pipeline_mode<synchronous>, transform_indices = @transform_4, window_bounds = array<i64: 1, 128>}, {pipeline_mode = #tpu.pipeline_mode<synchronous>, transform_indices = @transform_5, window_bounds = array<i64: 1, 128>}, {transform_indices = @transform_6, window_bounds = array<i64: 1, 1>}, {transform_indices = @transform_7, window_bounds = array<i64: 16, 128>}]} {
    %c0 = arith.constant 0 : index
    %c0_0 = arith.constant 0 : index
    %0 = vector.load %arg1[%c0, %c0_0] : memref<16x128xbf16, #tpu.memory_space<vmem>>, vector<16x128xbf16>
    %1 = arith.extf %0 : vector<16x128xbf16> to vector<16x128xf32>
    %c0_1 = arith.constant 0 : index
    %c0_2 = arith.constant 0 : index
    %2 = vector.load %arg2[%c0_1, %c0_2] : memref<128x128xbf16, #tpu.memory_space<vmem>>, vector<128x128xbf16>
    %cst = arith.constant dense<0.000000e+00> : vector<16x128xf32>
    %3 = tpu.matmul %0, %2, %cst {dimension_numbers = #tpu.dot_dimension_numbers<[1], [0], [0], [1], [0, 0, 1, 1], [], []>} : vector<16x128xbf16>, vector<128x128xbf16>, vector<16x128xf32> -> vector<16x128xf32>
    %c0_3 = arith.constant 0 : index
    %c0_4 = arith.constant 0 : index
    %4 = vector.load %arg3[%c0_3, %c0_4] : memref<1x128xf32, #tpu.memory_space<vmem>>, vector<1x128xf32>
    %5 = vector.broadcast %4 : vector<1x128xf32> to vector<16x128xf32>
    %6 = arith.addf %3, %5 : vector<16x128xf32>
    %cst_5 = arith.constant 5.000000e-01 : f32
    %7 = vector.broadcast %cst_5 : f32 to vector<16x128xf32>
    %8 = arith.mulf %7, %6 : vector<16x128xf32>
    %cst_6 = arith.constant 0.707106769 : f32
    %9 = vector.broadcast %cst_6 : f32 to vector<16x128xf32>
    %10 = arith.mulf %6, %9 : vector<16x128xf32>
    %11 = math.erf %10 : vector<16x128xf32>
    %cst_7 = arith.constant 1.000000e+00 : f32
    %12 = vector.broadcast %cst_7 : f32 to vector<16x128xf32>
    %13 = arith.addf %12, %11 : vector<16x128xf32>
    %14 = arith.mulf %8, %13 : vector<16x128xf32>
    %15 = arith.addf %14, %1 : vector<16x128xf32>
    %16 = arith.truncf %15 : vector<16x128xf32> to vector<16x128xbf16>
    %c0_8 = arith.constant 0 : index
    %c0_9 = arith.constant 0 : index
    %17 = vector.load %arg4[%c0_8, %c0_9] : memref<128x128xbf16, #tpu.memory_space<vmem>>, vector<128x128xbf16>
    %cst_10 = arith.constant dense<0.000000e+00> : vector<16x128xf32>
    %18 = tpu.matmul %16, %17, %cst_10 {dimension_numbers = #tpu.dot_dimension_numbers<[1], [0], [0], [1], [0, 0, 1, 1], [], []>} : vector<16x128xbf16>, vector<128x128xbf16>, vector<16x128xf32> -> vector<16x128xf32>
    %c0_11 = arith.constant 0 : index
    %c0_12 = arith.constant 0 : index
    %19 = vector.load %arg5[%c0_11, %c0_12] : memref<1x128xf32, #tpu.memory_space<vmem>>, vector<1x128xf32>
    %20 = vector.broadcast %19 : vector<1x128xf32> to vector<16x128xf32>
    %21 = arith.addf %18, %20 : vector<16x128xf32>
    %cst_13 = arith.constant 5.000000e-01 : f32
    %22 = vector.broadcast %cst_13 : f32 to vector<16x128xf32>
    %23 = arith.mulf %22, %21 : vector<16x128xf32>
    %cst_14 = arith.constant 0.707106769 : f32
    %24 = vector.broadcast %cst_14 : f32 to vector<16x128xf32>
    %25 = arith.mulf %21, %24 : vector<16x128xf32>
    %26 = math.erf %25 : vector<16x128xf32>
    %cst_15 = arith.constant 1.000000e+00 : f32
    %27 = vector.broadcast %cst_15 : f32 to vector<16x128xf32>
    %28 = arith.addf %27, %26 : vector<16x128xf32>
    %29 = arith.mulf %23, %28 : vector<16x128xf32>
    %30 = arith.addf %29, %15 : vector<16x128xf32>
    %c0_16 = arith.constant 0 : index
    %c0_17 = arith.constant 0 : index
    %31 = vector.load %arg6[%c0_16, %c0_17] : memref<1x128xf32, #tpu.memory_space<vmem>>, vector<1x128xf32>
    %32 = vector.broadcast %31 : vector<1x128xf32> to vector<16x128xf32>
    %33 = arith.mulf %30, %32 : vector<16x128xf32>
    %cst_18 = arith.constant dense<0.000000e+00> : vector<16xf32>
    %34 = vector.multi_reduction <add>, %33, %cst_18 [1] : vector<16x128xf32> to vector<16xf32>
    %35 = vector.shape_cast %34 : vector<16xf32> to vector<16x1xf32>
    %c0_19 = arith.constant 0 : index
    %c0_20 = arith.constant 0 : index
    %36 = memref.load %arg7[%c0_19, %c0_20] : memref<1x1xf32, #tpu.memory_space<smem>>
    %37 = vector.broadcast %36 : f32 to vector<16x1xf32>
    %38 = arith.addf %35, %37 : vector<16x1xf32>
    %39 = arith.negf %38 : vector<16x1xf32>
    %40 = math.exp %39 : vector<16x1xf32>
    %cst_21 = arith.constant 1.000000e+00 : f32
    %41 = vector.broadcast %cst_21 : f32 to vector<16x1xf32>
    %42 = arith.addf %41, %40 : vector<16x1xf32>
    %43 = arith.divf %41, %42 : vector<16x1xf32>
    %44 = vector.shape_cast %43 : vector<16x1xf32> to vector<16x1xf32>
    %45 = vector.broadcast %44 : vector<16x1xf32> to vector<16x128xf32>
    %46 = arith.truncf %45 : vector<16x128xf32> to vector<16x128xbf16>
    %c0_22 = arith.constant 0 : index
    %c0_23 = arith.constant 0 : index
    %47 = vector.load %arg8[%c0_22, %c0_23] : memref<16x128xbf16, #tpu.memory_space<vmem>>, vector<16x128xbf16>
    tpu.vector_store %arg8[%c0_22, %c0_23], %46 {strides = array<i32>} : memref<16x128xbf16, #tpu.memory_space<vmem>>, vector<16x128xbf16>,
    return
  }
  func.func @transform_0(%arg0: i32) -> (i32, i32) {
    %c0_i32 = arith.constant 0 : i32
    %c0_i32_0 = arith.constant 0 : i32
    return %arg0, %c0_i32 : i32, i32
  }
  func.func @transform_1(%arg0: i32) -> (i32, i32) {
    %c0_i32 = arith.constant 0 : i32
    %c0_i32_0 = arith.constant 0 : i32
    %c0_i32_1 = arith.constant 0 : i32
    return %c0_i32, %c0_i32_0 : i32, i32
  }
  func.func @transform_2(%arg0: i32) -> (i32, i32) {
    %c0_i32 = arith.constant 0 : i32
    %c0_i32_0 = arith.constant 0 : i32
    %c0_i32_1 = arith.constant 0 : i32
    return %c0_i32, %c0_i32_0 : i32, i32
  }
  func.func @transform_3(%arg0: i32) -> (i32, i32) {
    %c0_i32 = arith.constant 0 : i32
    %c0_i32_0 = arith.constant 0 : i32
    %c0_i32_1 = arith.constant 0 : i32
    return %c0_i32, %c0_i32_0 : i32, i32
  }
  func.func @transform_4(%arg0: i32) -> (i32, i32) {
    %c0_i32 = arith.constant 0 : i32
    %c0_i32_0 = arith.constant 0 : i32
    %c0_i32_1 = arith.constant 0 : i32
    return %c0_i32, %c0_i32_0 : i32, i32
  }
  func.func @transform_5(%arg0: i32) -> (i32, i32) {
    %c0_i32 = arith.constant 0 : i32
    %c0_i32_0 = arith.constant 0 : i32
    %c0_i32_1 = arith.constant 0 : i32
    return %c0_i32, %c0_i32_0 : i32, i32
  }
  func.func @transform_6(%arg0: i32) -> (i32, i32) {
    %c0_i32 = arith.constant 0 : i32
    %c0_i32_0 = arith.constant 0 : i32
    %c0_i32_1 = arith.constant 0 : i32
    return %c0_i32, %c0_i32_0 : i32, i32
  }
  func.func @transform_7(%arg0: i32) -> (i32, i32) {
    %c0_i32 = arith.constant 0 : i32
    %c0_i32_0 = arith.constant 0 : i32
    return %arg0, %c0_i32 : i32, i32
  }
}

</mosaic_0001>

<bundles_post_ra>
// kernel: tpu_custom_call.1
= control target key start
LH: loop header
LB: loop body
LE: loop exit
PB: predicated region body
PF: predicated region fallthrough
CT: control target
= control target key end

     0   :  { %13 = vsyncpa [#allocation4], 0  ;;  %s850_s0 = inlined_call_operand.hbm [shape: bf16[16,128], index: 0, kind: input, shape index: {}]   ;;  %s851_s1 = inlined_call_operand.hbm [shape: bf16[128,128], index: 1, kind: input, shape index: {}]   ;;  %s852_s2 = inlined_call_operand.vmem [shape: f32[1,128], index: 2, kind: input, shape index: {}]   ;;  %s853_s3 = inlined_call_operand.hbm [shape: bf16[128,128], index: 3, kind: input, shape index: {}]   ;;  %s854_s4 = inlined_call_operand.vmem [shape: f32[1,128], index: 4, kind: input, shape index: {}]   ;;  %s855_s5 = inlined_call_operand.vmem [shape: f32[1,128], index: 5, kind: input, shape index: {}]   ;;  %s856_s6 = inlined_call_operand.<no memory space> [shape: f32[1,1], index: 6, kind: input, shape index: {}]   ;;  %s857_s7 = inlined_call_operand.hbm [shape: bf16[16,128], index: 7, kind: output, shape index: {}]  }
   0x1   :  { %14 = vsyncpa [#allocation7], 0 }
   0x2   :  { %15 = vsyncpa [#allocation5], 0  ;;  %s33_s26 = sshll.u32 %s851_s1, 4  ;;  %s729_s27 = smov [#allocation6]   ;;  %s34_s26 = int_to_ptr.hbm [resolvable:$true] %s33_s26 }
   0x3   :  { %s35_s28 = sshll.u32 %s729_s27, 4  ;;  %s20_s8 = sshll.u32 %s850_s0, 4  ;;  %s36_s28 = int_to_ptr.vmem [resolvable:$true] %s35_s28  ;;  %s21_s8 = int_to_ptr.hbm [resolvable:$true] %s20_s8 }
   0x4   :  { %s730_s9 = smov 64   ;;  %s731_s10 = smov 4  }
   0x5   :  { %41 = dma.hbm_to_vmem [thread:$0]  %s34_s26, 1024, %s36_s28, [#allocation7], %s730_s9, %s730_s9, %s731_s10  }
   0x6   :  { %s732_s11 = smov [#allocation3]   ;;  %s48_s1 = sshll.u32 %s853_s3, 4  ;;  %s49_s1 = int_to_ptr.hbm [resolvable:$true] %s48_s1 }
   0x7   :  { %s22_s12 = sshll.u32 %s732_s11, 4  ;;  %s733_s0 = smov [#allocation8]   ;;  %s23_s12 = int_to_ptr.vmem [resolvable:$true] %s22_s12 }
   0x8   :  { %28 = dma.hbm_to_vmem [thread:$0]  %s21_s8, 128, %s23_s12, [#allocation4], %s730_s9, %s730_s9, %s731_s10  }
   0x9   :  { %s50_s15 = sshll.u32 %s733_s0, 4  ;;  %s51_s15 = int_to_ptr.vmem [resolvable:$true] %s50_s15 }
   0xa   :  { %56 = dma.hbm_to_vmem [thread:$0]  %s49_s1, 1024, %s51_s15, [#allocation7], %s730_s9, %s730_s9, %s731_s10  }
   0xb   :  { %723 = dma.done.wait [#allocation4], 128  }
   0xc   :  { %724 = vsyncadd [#allocation4], 4294967168 }
   0xd   :  { %725 = dma.done.wait [#allocation7], 2048  }
   0xe   :  { %726 = vsyncadd [#allocation7], 4294965248  ;;  %v588_v0 = vld [vmem:[#allocation6 + $0x38] sm:$0xff]  ;;  %v587_v1 = vld [vmem:[#allocation6 + $0x30] sm:$0xff]  ;;  %s492_s23 = sshll.u32 %s857_s7, 4  ;;  %s493_s23 = int_to_ptr.hbm [resolvable:$true] %s492_s23 }
   0xf   :  { %153 = vmatpush.bf16.msra.mxu0 %v588_v0  ;;  %v586_v2 = vld [vmem:[#allocation6 + $0x28] sm:$0xff]  ;;  %v585_v3 = vld [vmem:[#allocation6 + $0x20] sm:$0xff]  ;;  %v584_v4 = vld [vmem:[#allocation6 + $0x18] sm:$0xff] }
  0x10   :  { %v583_v5 = vld [vmem:[#allocation6 + $0x10] sm:$0xff]  ;;  %v582_v6 = vld [vmem:[#allocation6 + $0x8] sm:$0xff]  ;;  %v581_v7 = vld [vmem:[#allocation6] sm:$0xff] }
  0x11   :  { %v580_v8 = vld [vmem:[#allocation3] sm:$0xff]  ;;  %v595_v16 = vld [vmem:[#allocation8 + $0x30] sm:$0xff]  ;;  %v594_v23 = vld [vmem:[#allocation8 + $0x28] sm:$0xff] }
  0x12   :  { %v608_v9 = vld [vmem:[%s852_s2] ss:$0 sm:$0xff]  ;;  %v593_v29 = vld [vmem:[#allocation8 + $0x20] sm:$0xff]  ;;  %v591_v44 = vld [vmem:[#allocation8 + $0x10] sm:$0xff] }
  0x13   :  { %154 = vmatpush.bf16.msra.mxu0 %v587_v1  ;;  %v596_v13 = vld [vmem:[#allocation8 + $0x38] sm:$0xff]  ;;  %v590_v51 = vld [vmem:[#allocation8 + $0x8] sm:$0xff]  ;;  %v589_v55 = vld [vmem:[#allocation8] sm:$0xff] }
  0x14   :  { %326 = vmatpush.bf16.msra.mxu1 %v596_v13  ;;  %v592_v36 = vld [vmem:[#allocation8 + $0x18] sm:$0xff] }
  0x17   :  { %155 = vmatpush.bf16.msra.mxu0 %v586_v2 }
  0x18   :  { %327 = vmatpush.bf16.msra.mxu1 %v595_v16 }
  0x1b   :  { %156 = vmatpush.bf16.msra.mxu0 %v585_v3 }
  0x1c   :  { %328 = vmatpush.bf16.msra.mxu1 %v594_v23 }
  0x1f   :  { %157 = vmatpush.bf16.msra.mxu0 %v584_v4 }
  0x20   :  { %329 = vmatpush.bf16.msra.mxu1 %v593_v29 }
  0x23   :  { %158 = vmatpush.bf16.msra.mxu0 %v583_v5 }
  0x24   :  { %330 = vmatpush.bf16.msra.mxu1 %v592_v36 }
  0x27   :  { %159 = vmatpush.bf16.msra.mxu0 %v582_v6 }
  0x28   :  { %331 = vmatpush.bf16.msra.mxu1 %v591_v44 }
  0x2b   :  { %160 = vmatpush.bf16.msra.mxu0 %v581_v7 }
  0x2c   :  { %332 = vmatpush.bf16.msra.mxu1 %v590_v51 }
  0x2e   :  { %161 = vmatmul.bf16.vlgmr.msra.gmra.mxu0 %v580_v8 }
  0x30   :  { %333 = vmatpush.bf16.msra.mxu1 %v589_v55 }
  0xab   :  { %v162_v10 = vpop.f32.mrf.mxu0 }
  0xac   :  { %v796_v11 = vadd.f32 %v608_v9, %v162_v10 }
  0xae   :  { %v799_v12 = vmul.f32 0.70710677, %v796_v11 }
  0xb0   :  { %v171_v14 = vmul.f32 %v799_v12, %v799_v12 }
  0xb2   :  { %v172_v15 = vmin.f32 %v171_v14, 16.0 }
  0xb3   :  { %v164_v17 = vpop.f32.mrf.mxu0 }
  0xb4   :  { %v173_v18 = vmul.f32 2.1237322e-06, %v172_v15  ;;  %v184_v19 = vmul.f32 3.8918573e-05, %v172_v15  ;;  %v803_v20 = vadd.f32 %v608_v9, %v164_v17 }
  0xb6   :  { %v174_v21 = vadd.f32 0.00028619796, %v173_v18  ;;  %v185_v22 = vadd.f32 0.001143296, %v184_v19  ;;  %v806_v24 = vmul.f32 0.70710677, %v803_v20 }
  0xb7   :  { %v168_v36 = vmul.f32 0.5, %v803_v20 }
  0xb8   :  { %v175_v25 = vmul.f32 %v174_v21, %v172_v15  ;;  %v186_v26 = vmul.f32 %v185_v22, %v172_v15  ;;  %v211_v27 = vmul.f32 %v806_v24, %v806_v24 }
  0xba   :  { %v187_v28 = vadd.f32 0.014752088, %v186_v26  ;;  %v212_v30 = vmin.f32 %v211_v27, 16.0  ;;  %v176_v31 = vadd.f32 0.0036580483, %v175_v25 }
  0xbc   :  { %v188_v32 = vmul.f32 %v187_v28, %v172_v15  ;;  %v213_v33 = vmul.f32 2.1237322e-06, %v212_v30  ;;  %v224_v34 = vmul.f32 3.8918573e-05, %v212_v30  ;;  %v177_v39 = vmul.f32 %v176_v31, %v172_v15 }
  0xbe   :  { %v189_v35 = vadd.f32 0.112945676, %v188_v32  ;;  %v214_v37 = vadd.f32 0.00028619796, %v213_v33  ;;  %v225_v38 = vadd.f32 0.001143296, %v224_v34 }
  0xbf   :  { %v178_v46 = vadd.f32 0.05243302, %v177_v39  ;;  %v75_v33 = vld [vmem:[#allocation3] sm:$0xff]   ;;  %v167_v34 = vmul.f32 0.5, %v796_v11 }
  0xc0   :  { %v190_v40 = vmul.f32 %v189_v35, %v172_v15  ;;  %v215_v41 = vmul.f32 %v214_v37, %v212_v30  ;;  %v226_v42 = vmul.f32 %v225_v38, %v212_v30  ;;  %v77_v39 = vunpack.c.l.bf16 %v75_v33  ;;  %v609_v11 = vld [vmem:[%s854_s4] ss:$0 sm:$0xff] }
  0xc1   :  { %v179_v53 = vmul.f32 %v178_v46, %v172_v15 }
  0xc2   :  { %v191_v43 = vadd.f32 0.4994258, %v190_v40  ;;  %v227_v45 = vadd.f32 0.014752088, %v226_v42  ;;  %v216_v48 = vadd.f32 0.0036580483, %v215_v41  ;;  %v78_v40 = vunpack.c.h.bf16 %v75_v33 }
  0xc3   :  { %v180_v58 = vadd.f32 0.18741608, %v179_v53 }
  0xc4   :  { %v192_v47 = vmul.f32 %v191_v43, %v172_v15  ;;  %v228_v49 = vmul.f32 %v227_v45, %v212_v30  ;;  %v217_v54 = vmul.f32 %v216_v48, %v212_v30 }
  0xc5   :  { %v181_v0 = vmul.f32 %v180_v58, %v172_v15 }
  0xc6   :  { %v193_v50 = vadd.f32 1.0, %v192_v47  ;;  %v229_v52 = vadd.f32 0.112945676, %v228_v49  ;;  %v218_v59 = vadd.f32 0.05243302, %v217_v54 }
  0xc7   :  { %v182_v6 = vadd.f32 1.1283791, %v181_v0 }
  0xc8   :  { %611 = vrcp.f32 %v193_v50  ;;  %v230_v56 = vmul.f32 %v229_v52, %v212_v30  ;;  %v219_v1 = vmul.f32 %v218_v59, %v212_v30  ;;  %v205_v3 = vand.u32 2147483648, %v193_v50 }
  0xc9   :  { %v203_v5 = vand.u32 2147483647, %v193_v50  ;;  %vm199_vm1 = vweird.f32 %v193_v50  ;;  %v183_v14 = vmul.f32 %v182_v6, %v799_v12 }
  0xca   :  { %v231_v57 = vadd.f32 0.4994258, %v230_v56  ;;  %v220_v7 = vadd.f32 0.18741608, %v219_v1  ;;  %v206_v9 = vor.u32 1.1754944e-38, %v205_v3 }
  0xcb   :  { %vm204_vm3 = vcmp.eq.f32.partialorder %v203_v5, 8.507059e+37 }
  0xcc   :  { %v232_v60 = vmul.f32 %v231_v57, %v212_v30  ;;  %v221_v15 = vmul.f32 %v220_v7, %v212_v30 }
  0xce   :  { %v612_v61 = vpop.eup %611  ;;  %v233_v63 = vadd.f32 1.0, %v232_v60  ;;  %v222_v22 = vadd.f32 1.1283791, %v221_v15 }
  0xcf   :  { %v195_v62 = vmul.f32 %v612_v61, %v193_v50  ;;  %vm200_vm0 = vweird.f32 %v612_v61 }
  0xd0   :  { %613 = vrcp.f32 %v233_v63  ;;  %vm201_vm2 = vmor %vm199_vm1, %vm200_vm0  ;;  %v245_v21 = vand.u32 2147483648, %v233_v63  ;;  %v243_v25 = vand.u32 2147483647, %v233_v63  ;;  %vm239_vm5 = vweird.f32 %v233_v63 }
  0xd1   :  { %v196_v2 = vsub.f32 1.0, %v195_v62  ;;  %v223_v29 = vmul.f32 %v222_v22, %v806_v24 }
  0xd2   :  { %v246_v28 = vor.u32 1.1754944e-38, %v245_v21  ;;  %vm244_vm7 = vcmp.eq.f32.partialorder %v243_v25, 8.507059e+37 }
  0xd3   :  { %v197_v4 = vmul.f32 %v612_v61, %v196_v2 }
  0xd5   :  { %v198_v8 = vadd.f32 %v612_v61, %v197_v4 }
  0xd6   :  { %v614_v10 = vpop.eup %613 }
  0xd7   :  { %v202_v13 = vsel %vm201_vm2, %v612_v61, %v198_v8  ;;  %v235_v17 = vmul.f32 %v614_v10, %v233_v63  ;;  %vm240_vm4 = vweird.f32 %v614_v10 }
  0xd8   :  { %v207_v16 = vsel %vm204_vm3, %v206_v9, %v202_v13  ;;  %vm241_vm6 = vmor %vm239_vm5, %vm240_vm4 }
  0xd9   :  { %v208_v18 = vmul.f32 %v207_v16, %v183_v14  ;;  %v236_v19 = vsub.f32 1.0, %v235_v17 }
  0xdb   :  { %v237_v23 = vmul.f32 %v614_v10, %v236_v19  ;;  %v542_v26 = vclamps-f32 %v208_v18, 1.0 }
  0xdd   :  { %v238_v27 = vadd.f32 %v614_v10, %v237_v23  ;;  %v251_v32 = vadd.f32 1.0, %v542_v26 }
  0xdf   :  { %v242_v31 = vsel %vm241_vm6, %v614_v10, %v238_v27  ;;  %v253_v37 = vmul.f32 %v251_v32, %v167_v34 }
  0xe0   :  { %v247_v12 = vsel %vm244_vm7, %v246_v28, %v242_v31 }
  0xe1   :  { %v248_v30 = vmul.f32 %v247_v12, %v223_v29  ;;  %v814_v42 = vadd.f32 %v253_v37, %v77_v39 }
  0xe3   :  { %v543_v35 = vclamps-f32 %v248_v30, 1.0 }
  0xe5   :  { %v252_v38 = vadd.f32 1.0, %v543_v35 }
  0xe7   :  { %v254_v41 = vmul.f32 %v252_v38, %v168_v36 }
  0xe9   :  { %v816_v43 = vadd.f32 %v254_v41, %v78_v40 }
  0xeb   :  { %v257_v24 = vpack.c.bf16 %v816_v43, %v814_v42 }
  0xed   :  { %334 = vmatmul.bf16.vlgmr.msra.gmra.mxu1 %v257_v24 }
 0x16a   :  { %v335_v44 = vpop.f32.mrf.mxu1 }
 0x16b   :  { %v823_v45 = vadd.f32 %v609_v11, %v335_v44 }
 0x16d   :  { %v342_v20 = vmul.f32 0.70710677, %v823_v45 }
 0x16f   :  { %v344_v46 = vmul.f32 %v342_v20, %v342_v20 }
 0x171   :  { %v345_v47 = vmin.f32 %v344_v46, 16.0 }
 0x172   :  { %v337_v48 = vpop.f32.mrf.mxu1 }
 0x173   :  { %v346_v49 = vmul.f32 2.1237322e-06, %v345_v47  ;;  %v357_v50 = vmul.f32 3.8918573e-05, %v345_v47  ;;  %v826_v51 = vadd.f32 %v609_v11, %v337_v48 }
 0x175   :  { %v347_v52 = vadd.f32 0.00028619796, %v346_v49  ;;  %v358_v53 = vadd.f32 0.001143296, %v357_v50  ;;  %v829_v54 = vmul.f32 0.70710677, %v826_v51 }
 0x177   :  { %v348_v55 = vmul.f32 %v347_v52, %v345_v47  ;;  %v359_v56 = vmul.f32 %v358_v53, %v345_v47  ;;  %v384_v57 = vmul.f32 %v829_v54, %v829_v54  ;;  %v340_v53 = vmul.f32 0.5, %v823_v45 }
 0x179   :  { %v360_v58 = vadd.f32 0.014752088, %v359_v56  ;;  %v349_v59 = vadd.f32 0.0036580483, %v348_v55  ;;  %v385_v60 = vmin.f32 %v384_v57, 16.0 }
 0x17b   :  { %v361_v61 = vmul.f32 %v360_v58, %v345_v47  ;;  %v386_v62 = vmul.f32 2.1237322e-06, %v385_v60  ;;  %v397_v63 = vmul.f32 3.8918573e-05, %v385_v60  ;;  %v350_v1 = vmul.f32 %v349_v59, %v345_v47  ;;  %v610_v58 = vld [vmem:[%s855_s5] ss:$0 sm:$0xff] }
 0x17d   :  { %v362_v0 = vadd.f32 0.112945676, %v361_v61  ;;  %v387_v2 = vadd.f32 0.00028619796, %v386_v62  ;;  %v398_v3 = vadd.f32 0.001143296, %v397_v63 }
 0x17e   :  { %v351_v8 = vadd.f32 0.05243302, %v350_v1  ;;  %v341_v1 = vmul.f32 0.5, %v826_v51 }
 0x17f   :  { %v363_v4 = vmul.f32 %v362_v0, %v345_v47  ;;  %v388_v5 = vmul.f32 %v387_v2, %v385_v60  ;;  %v399_v6 = vmul.f32 %v398_v3, %v385_v60 }
 0x180   :  { %v352_v15 = vmul.f32 %v351_v8, %v345_v47 }
 0x181   :  { %v364_v7 = vadd.f32 0.4994258, %v363_v4  ;;  %v400_v9 = vadd.f32 0.014752088, %v399_v6  ;;  %v389_v13 = vadd.f32 0.0036580483, %v388_v5 }
 0x182   :  { %v353_v21 = vadd.f32 0.18741608, %v352_v15 }
 0x183   :  { %v365_v10 = vmul.f32 %v364_v7, %v345_v47  ;;  %v401_v14 = vmul.f32 %v400_v9, %v385_v60  ;;  %v390_v18 = vmul.f32 %v389_v13, %v385_v60 }
 0x184   :  { %v354_v27 = vmul.f32 %v353_v21, %v345_v47 }
 0x185   :  { %v366_v16 = vadd.f32 1.0, %v365_v10  ;;  %v402_v17 = vadd.f32 0.112945676, %v401_v14  ;;  %v391_v23 = vadd.f32 0.05243302, %v390_v18 }
 0x186   :  { %v355_v30 = vadd.f32 1.1283791, %v354_v27 }
 0x187   :  { %615 = vrcp.f32 %v366_v16  ;;  %v403_v19 = vmul.f32 %v402_v17, %v385_v60  ;;  %v392_v31 = vmul.f32 %v391_v23, %v385_v60  ;;  %v378_v32 = vand.u32 2147483648, %v366_v16 }
 0x188   :  { %v376_v34 = vand.u32 2147483647, %v366_v16  ;;  %vm372_vm9 = vweird.f32 %v366_v16  ;;  %v356_v39 = vmul.f32 %v355_v30, %v342_v20 }
 0x189   :  { %v404_v22 = vadd.f32 0.4994258, %v403_v19  ;;  %v393_v35 = vadd.f32 0.18741608, %v392_v31  ;;  %v379_v37 = vor.u32 1.1754944e-38, %v378_v32 }
 0x18a   :  { %vm377_vm11 = vcmp.eq.f32.partialorder %v376_v34, 8.507059e+37 }
 0x18b   :  { %v405_v25 = vmul.f32 %v404_v22, %v385_v60  ;;  %v394_v24 = vmul.f32 %v393_v35, %v385_v60 }
 0x18d   :  { %v616_v26 = vpop.eup %615  ;;  %v406_v29 = vadd.f32 1.0, %v405_v25  ;;  %v395_v49 = vadd.f32 1.1283791, %v394_v24 }
 0x18e   :  { %v368_v28 = vmul.f32 %v616_v26, %v366_v16  ;;  %vm373_vm8 = vweird.f32 %v616_v26 }
 0x18f   :  { %617 = vrcp.f32 %v406_v29  ;;  %vm374_vm10 = vmor %vm372_vm9, %vm373_vm8  ;;  %v418_v47 = vand.u32 2147483648, %v406_v29  ;;  %v416_v52 = vand.u32 2147483647, %v406_v29  ;;  %vm412_vm13 = vweird.f32 %v406_v29 }
 0x190   :  { %v369_v12 = vsub.f32 1.0, %v368_v28  ;;  %v396_v59 = vmul.f32 %v395_v49, %v829_v54  ;;  %v441_v54 = vstv %s856_s6  ;;  %s734_s6 = smov [#allocation9]  }
 0x191   :  { %v419_v20 = vor.u32 1.1754944e-38, %v418_v47  ;;  %vm417_vm15 = vcmp.eq.f32.partialorder %v416_v52, 8.507059e+37  ;;  %s490_s20 = sshll.u32 %s734_s6, 4  ;;  %s491_s20 = int_to_ptr.vmem [resolvable:$true] %s490_s20 }
 0x192   :  { %v370_v33 = vmul.f32 %v616_v26, %v369_v12 }
 0x194   :  { %v371_v36 = vadd.f32 %v616_v26, %v370_v33 }
 0x195   :  { %v618_v38 = vpop.eup %617 }
 0x196   :  { %v375_v40 = vsel %vm374_vm10, %v616_v26, %v371_v36  ;;  %v408_v11 = vmul.f32 %v618_v38, %v406_v29  ;;  %vm413_vm12 = vweird.f32 %v618_v38 }
 0x197   :  { %v380_v41 = vsel %vm377_vm11, %v379_v37, %v375_v40  ;;  %vm414_vm14 = vmor %vm412_vm13, %vm413_vm12 }
 0x198   :  { %v381_v44 = vmul.f32 %v380_v41, %v356_v39  ;;  %v409_v46 = vsub.f32 1.0, %v408_v11 }
 0x19a   :  { %v576_v48 = vclamps-f32 %v381_v44, 1.0  ;;  %v410_v50 = vmul.f32 %v618_v38, %v409_v46 }
 0x19c   :  { %v424_v55 = vadd.f32 1.0, %v576_v48  ;;  %v411_v56 = vadd.f32 %v618_v38, %v410_v50 }
 0x19e   :  { %v426_v57 = vmul.f32 %v424_v55, %v340_v53  ;;  %v415_v60 = vsel %vm414_vm14, %v618_v38, %v411_v56 }
 0x19f   :  { %v420_v61 = vsel %vm417_vm15, %v419_v20, %v415_v60 }
 0x1a0   :  { %v428_v62 = vadd.f32 %v426_v57, %v814_v42  ;;  %v421_v63 = vmul.f32 %v420_v61, %v396_v59 }
 0x1a2   :  { %v434_v0 = vmul.f32 %v610_v58, %v428_v62  ;;  %v577_v45 = vclamps-f32 %v421_v63, 1.0 }
 0x1a4   :  { %436 = vadd.xlane.f32.xlu0 %v434_v0  ;;  %v425_v2 = vadd.f32 1.0, %v577_v45 }
 0x1a6   :  { %v427_v3 = vmul.f32 %v425_v2, %v341_v1 }
 0x1a8   :  { %v429_v4 = vadd.f32 %v427_v3, %v816_v43 }
 0x1aa   :  { %v435_v5 = vmul.f32 %v610_v58, %v429_v4 }
 0x1ac   :  { %438 = vadd.xlane.f32.xlu0 %v435_v5 }
 0x217   :  { %v437_v6 = vpop.xlane.xlu0 %436 }
 0x218   :  { %v442_v7 = vadd.f32 %v441_v54, %v437_v6 }
 0x21a   :  { %v578_v8 = vmul.f32 -1.442695, %v442_v7 }
 0x21c   :  { %619 = vpow2.f32 %v578_v8 }
 0x21f   :  { %v439_v42 = vpop.xlane.xlu0 %438 }
 0x220   :  { %v443_v9 = vadd.f32 %v441_v54, %v439_v42 }
 0x222   :  { %v620_v10 = vpop.eup %619  ;;  %v579_v14 = vmul.f32 -1.442695, %v443_v9 }
 0x223   :  { %v450_v13 = vadd.f32 1.0, %v620_v10 }
 0x225   :  { %621 = vrcp.f32 %v450_v13  ;;  %vm457_vm1 = vweird.f32 %v450_v13  ;;  %v463_v25 = vand.u32 2147483648, %v450_v13  ;;  %v461_v27 = vand.u32 2147483647, %v450_v13 }
 0x226   :  { %623 = vpow2.f32 %v579_v14 }
 0x227   :  { %v464_v32 = vor.u32 1.1754944e-38, %v463_v25  ;;  %vm462_vm6 = vcmp.eq.f32.partialorder %v461_v27, 8.507059e+37 }
 0x22b   :  { %v622_v51 = vpop.eup %621 }
 0x22c   :  { %v624_v16 = vpop.eup %623  ;;  %v453_v43 = vmul.f32 %v622_v51, %v450_v13  ;;  %vm458_vm0 = vweird.f32 %v622_v51 }
 0x22d   :  { %v451_v15 = vadd.f32 1.0, %v624_v16  ;;  %vm459_vm3 = vmor %vm457_vm1, %vm458_vm0 }
 0x22e   :  { %v454_v17 = vsub.f32 1.0, %v453_v43 }
 0x22f   :  { %625 = vrcp.f32 %v451_v15  ;;  %v478_v26 = vand.u32 2147483648, %v451_v15  ;;  %v476_v29 = vand.u32 2147483647, %v451_v15  ;;  %vm472_vm4 = vweird.f32 %v451_v15 }
 0x230   :  { %v455_v18 = vmul.f32 %v622_v51, %v454_v17 }
 0x231   :  { %v479_v30 = vor.u32 1.1754944e-38, %v478_v26  ;;  %vm477_vm7 = vcmp.eq.f32.partialorder %v476_v29, 8.507059e+37 }
 0x232   :  { %v456_v23 = vadd.f32 %v622_v51, %v455_v18 }
 0x234   :  { %v460_v31 = vsel %vm459_vm3, %v622_v51, %v456_v23 }
 0x235   :  { %v626_v19 = vpop.eup %625  ;;  %v465_v34 = vsel %vm462_vm6, %v464_v32, %v460_v31 }
 0x236   :  { %v468_v21 = vmul.f32 %v626_v19, %v451_v15  ;;  %vm473_vm2 = vweird.f32 %v626_v19 }
 0x237   :  { %vm474_vm5 = vmor %vm472_vm4, %vm473_vm2 }
 0x238   :  { %v469_v22 = vsub.f32 1.0, %v468_v21 }
 0x23a   :  { %v470_v28 = vmul.f32 %v626_v19, %v469_v22 }
 0x23c   :  { %v471_v12 = vadd.f32 %v626_v19, %v470_v28 }
 0x23e   :  { %v475_v33 = vsel %vm474_vm5, %v626_v19, %v471_v12 }
 0x23f   :  { %v480_v35 = vsel %vm477_vm7, %v479_v30, %v475_v33 }
 0x240   :  { %v600_v36 = vpack.c.bf16 %v480_v35, %v465_v34 }
 0x242   :  { %601 = vst [vmem:[#allocation9] sm:$0xff] %v600_v36  }
 0x243   :  { %498 = dma.vmem_to_hbm [thread:$0]  %s491_s20, 128, %s493_s23, [#allocation5], %s730_s9, %s730_s9, %s731_s10  }
 0x244   :  { %727 = dma.done.wait [#allocation5], 128  }
 0x245   :  { %728 = vsyncadd [#allocation5], 4294967168 }
 0x246   :  { %503 = vsyncpa [#allocation4], 1 }
 0x247   :  { %504 = vsyncpa [#allocation7], 1 }
 0x248   :  { %505 = vsyncpa [#allocation5], 1 }

</bundles_post_ra>
